<compile_context>
chip_gen: v7x
topology: tpu7x:2x2x1
jax: 0.10.0
libtpu: 0.0.40
codegen_flags: <defaults>
</compile_context>

<pallas_src>
import jax
import jax.numpy as jnp
from jax.experimental import pallas as pl
from jax.experimental.pallas import tpu as pltpu

INPUT_SIZE = 10
HIDDEN_SIZE = 5
OUTPUT_SIZE = 1

_LANE = 128
_TARGET_X_BLOCK_BYTES = 3 * 1024 * 1024   # per-step x tile (Pallas double-buffers it)


def _round_up(n, m):
    return (n + m - 1) // m * m


def _cdiv(a, b):
    return (a + b - 1) // b


def _pick_group_size():
    """Batch elements packed per MXU pass (contraction K = G * INPUT_SIZE).

    v6e / v7x MXUs are 256 deep in K -> G=25 (K=250); 128-deep MXUs (v5e and
    older) -> G=12 (K=120).  Any value is numerically correct."""
    try:
        kind = jax.devices()[0].device_kind.lower()
    except Exception:
        kind = ""
    if ("v6" in kind) or ("v7" in kind):
        return 25
    return 12


def simple_nn_kernel(x_ref, w1_ref, b1_ref, w2_ref, b2_ref, o_ref):
    # x_ref:  [G*10, tc]        packed input (lane-dense batch columns)
    # w1_ref: [5G, 10G]         block-diagonal fc1 weight, VMEM-resident
    # b1_ref: [5G, 1]           stacked fc1 bias (broadcasts along lanes)
    # w2_ref: [G*1, 5G]         block-diagonal fc2 weight, VMEM-resident
    # b2_ref: [1]               fc2 bias scalar in SMEM
    # o_ref:  [G*1, tc]         packed output (lane-dense)
    h = jnp.dot(w1_ref[...], x_ref[...], preferred_element_type=jnp.float32) + b1_ref[...]
    h = jnp.maximum(h, 0.0)                                      # ReLU
    o_ref[...] = (
        jnp.dot(w2_ref[...], h, preferred_element_type=jnp.float32) + b2_ref[0]
    )


def simple_nn_forward(x, w1, b1, w2, b2, *, group_size=None):
    """x: [B, INPUT_SIZE] f32, w1: [HIDDEN, INPUT], b1: [HIDDEN],
    w2: [OUTPUT, HIDDEN], b2: [OUTPUT]  ->  [B, OUTPUT_SIZE] f32."""
    B = x.shape[0]
    G = _pick_group_size() if group_size is None else group_size

    # ---- tiling over packed batch columns (each column = G batch elements) ----
    cols_needed = _round_up(_cdiv(B, G), _LANE)
    tc_max = max(_LANE, (_TARGET_X_BLOCK_BYTES // (G * INPUT_SIZE * 4)) // _LANE * _LANE)
    n_steps = _cdiv(cols_needed, tc_max)
    if n_steps == 1 and cols_needed >= 2 * _LANE:
        n_steps = 2                      # keep >=2 grid steps: feeds both v7x TCs
    tc = _round_up(_cdiv(cols_needed, n_steps), _LANE)
    cols = tc * n_steps                  # padded column count (multiple of 128)

    # ---- pack x once in the wrapper: [B, 10] -> [G*10, cols] ----
    bp = cols * G
    x_pad = jnp.pad(x, ((0, bp - B), (0, 0))) if bp != B else x
    x_packed = x_pad.reshape(cols, G * INPUT_SIZE).T            # [G*10, cols]

    # ---- block-diagonal weights / stacked biases (tiny, built once) ----
    eye_g = jnp.eye(G, dtype=jnp.float32)
    w1_bd = jnp.kron(eye_g, w1)                                  # [5G, 10G]
    w2_bd = jnp.kron(eye_g, w2)                                  # [G,  5G ]
    b1_bd = jnp.tile(b1, G).reshape(G * HIDDEN_SIZE, 1)          # [5G, 1]
    b2_s = b2.reshape(OUTPUT_SIZE)                               # [1] -> SMEM

    out_packed = pl.pallas_call(
        simple_nn_kernel,
        out_shape=jax.ShapeDtypeStruct((G * OUTPUT_SIZE, cols), jnp.float32),
        grid=(n_steps,),
        in_specs=[
            # x streams over the packed-batch (lane) axis -> pipelined DMA.
            pl.BlockSpec((G * INPUT_SIZE, tc), lambda i: (0, i)),
            # Weights / bias column: constant block index -> resident in VMEM.
            pl.BlockSpec((G * HIDDEN_SIZE, G * INPUT_SIZE), lambda i: (0, 0)),
            pl.BlockSpec((G * HIDDEN_SIZE, 1), lambda i: (0, 0)),
            pl.BlockSpec((G * OUTPUT_SIZE, G * HIDDEN_SIZE), lambda i: (0, 0)),
            # fc2 bias as an SMEM scalar (no tiny VMEM stream).
            pl.BlockSpec(memory_space=pltpu.MemorySpace.SMEM),
        ],
        out_specs=pl.BlockSpec((G * OUTPUT_SIZE, tc), lambda i: (0, i)),
        compiler_params=pltpu.CompilerParams(
            dimension_semantics=("parallel",),
        ),
    )(x_packed, w1_bd, b1_bd, w2_bd, b2_s)

    # ---- unpack: [G*OUT, cols] -> [B, OUT]; padded rows never alias real ones ----
    out = out_packed.T.reshape(cols * G, OUTPUT_SIZE)[:B]
    return out


def init_params(key):
    """Deterministic init mimicking nn.Linear's uniform(-1/sqrt(fan_in), ...).
    Weights stored PyTorch-style [out_features, in_features]."""
    k1, k2, k3, k4 = jax.random.split(key, 4)
    bound1 = 1.0 / jnp.sqrt(INPUT_SIZE)
    bound2 = 1.0 / jnp.sqrt(HIDDEN_SIZE)
    w1 = jax.random.uniform(k1, (HIDDEN_SIZE, INPUT_SIZE), jnp.float32, -bound1, bound1)
    b1 = jax.random.uniform(k2, (HIDDEN_SIZE,), jnp.float32, -bound1, bound1)
    w2 = jax.random.uniform(k3, (OUTPUT_SIZE, HIDDEN_SIZE), jnp.float32, -bound2, bound2)
    b2 = jax.random.uniform(k4, (OUTPUT_SIZE,), jnp.float32, -bound2, bound2)
    return w1, b1, w2, b2


def _reference(x, w1, b1, w2, b2):
    # Plain-JAX reference with identical semantics to the PyTorch forward.
    return jnp.maximum(x @ w1.T + b1, 0.0) @ w2.T + b2


if __name__ == "__main__":
    key = jax.random.PRNGKey(0)
    k_params, kx1, kx2, kx3 = jax.random.split(key, 4)
    w1, b1, w2, b2 = init_params(k_params)

    tests = (
        ("single-tile", 8, kx1),      # block == full array path
        ("odd-batch", 200, kx2),      # non-multiple-of-G / 128 tail handling
        ("multi-step", 3333, kx3),    # >=2 grid steps (megacore path on v7x)
    )
    for name, batch, kx in tests:
        x = jax.random.normal(kx, (batch, INPUT_SIZE), jnp.float32)
        out = jax.block_until_ready(simple_nn_forward(x, w1, b1, w2, b2))
        ref = _reference(x, w1, b1, w2, b2)
        assert out.shape == (batch, OUTPUT_SIZE), name
        assert jnp.allclose(out, ref, atol=1e-5, rtol=1e-5), name

    print("KERNEL_OK")
</pallas_src>

<mosaic_0001>
module attributes {stable_mosaic.version = 11 : i64} {
  func.func @simple_nn_kernel(%arg0: i32, %arg1: memref<120x128xf32, #tpu.memory_space<vmem>>, %arg2: memref<60x120xf32, #tpu.memory_space<vmem>>, %arg3: memref<60x1xf32, #tpu.memory_space<vmem>>, %arg4: memref<12x60xf32, #tpu.memory_space<vmem>>, %arg5: memref<1xf32, #tpu.memory_space<smem>>, %arg6: memref<12x128xf32, #tpu.memory_space<vmem>>) attributes {dimension_semantics = [#tpu.dimension_semantics<parallel>], iteration_bounds = array<i64: 1>, scalar_prefetch = 0 : i64, scratch_operands = 0 : i64, tpu.core_type = #tpu.core_type<tc>, window_params = [{transform_indices = @transform_0, window_bounds = array<i64: 120, 128>}, {pipeline_mode = #tpu.pipeline_mode<synchronous>, transform_indices = @transform_1, window_bounds = array<i64: 60, 120>}, {pipeline_mode = #tpu.pipeline_mode<synchronous>, transform_indices = @transform_2, window_bounds = array<i64: 60, 1>}, {pipeline_mode = #tpu.pipeline_mode<synchronous>, transform_indices = @transform_3, window_bounds = array<i64: 12, 60>}, {transform_indices = @transform_4, window_bounds = array<i64: 1>}, {transform_indices = @transform_5, window_bounds = array<i64: 12, 128>}]} {
    %c0 = arith.constant 0 : index
    %c0_0 = arith.constant 0 : index
    %0 = vector.load %arg2[%c0, %c0_0] : memref<60x120xf32, #tpu.memory_space<vmem>>, vector<60x120xf32>
    %c0_1 = arith.constant 0 : index
    %c0_2 = arith.constant 0 : index
    %1 = vector.load %arg1[%c0_1, %c0_2] : memref<120x128xf32, #tpu.memory_space<vmem>>, vector<120x128xf32>
    %cst = arith.constant dense<0.000000e+00> : vector<60x128xf32>
    %2 = tpu.matmul %0, %1, %cst {dimension_numbers = #tpu.dot_dimension_numbers<[1], [0], [0], [1], [0, 0, 1, 1], [], []>} : vector<60x120xf32>, vector<120x128xf32>, vector<60x128xf32> -> vector<60x128xf32>
    %c0_3 = arith.constant 0 : index
    %c0_4 = arith.constant 0 : index
    %3 = vector.load %arg3[%c0_3, %c0_4] : memref<60x1xf32, #tpu.memory_space<vmem>>, vector<60x1xf32>
    %4 = vector.broadcast %3 : vector<60x1xf32> to vector<60x128xf32>
    %5 = arith.addf %2, %4 : vector<60x128xf32>
    %cst_5 = arith.constant 0.000000e+00 : f32
    %6 = vector.broadcast %cst_5 : f32 to vector<60x128xf32>
    %7 = arith.maximumf %5, %6 : vector<60x128xf32>
    %c0_6 = arith.constant 0 : index
    %c0_7 = arith.constant 0 : index
    %8 = vector.load %arg4[%c0_6, %c0_7] : memref<12x60xf32, #tpu.memory_space<vmem>>, vector<12x60xf32>
    %cst_8 = arith.constant dense<0.000000e+00> : vector<12x128xf32>
    %9 = tpu.matmul %8, %7, %cst_8 {dimension_numbers = #tpu.dot_dimension_numbers<[1], [0], [0], [1], [0, 0, 1, 1], [], []>} : vector<12x60xf32>, vector<60x128xf32>, vector<12x128xf32> -> vector<12x128xf32>
    %c0_9 = arith.constant 0 : index
    %10 = memref.load %arg5[%c0_9] : memref<1xf32, #tpu.memory_space<smem>>
    %11 = vector.broadcast %10 : f32 to vector<12x128xf32>
    %12 = arith.addf %9, %11 : vector<12x128xf32>
    %c0_10 = arith.constant 0 : index
    %c0_11 = arith.constant 0 : index
    %13 = vector.load %arg6[%c0_10, %c0_11] : memref<12x128xf32, #tpu.memory_space<vmem>>, vector<12x128xf32>
    tpu.vector_store %arg6[%c0_10, %c0_11], %12 {strides = array<i32>} : memref<12x128xf32, #tpu.memory_space<vmem>>, vector<12x128xf32>,
    return
  }
  func.func @transform_0(%arg0: i32) -> (i32, i32) {
    %c0_i32 = arith.constant 0 : i32
    %c0_i32_0 = arith.constant 0 : i32
    return %c0_i32, %arg0 : i32, i32
  }
  func.func @transform_1(%arg0: i32) -> (i32, i32) {
    %c0_i32 = arith.constant 0 : i32
    %c0_i32_0 = arith.constant 0 : i32
    %c0_i32_1 = arith.constant 0 : i32
    return %c0_i32, %c0_i32_0 : i32, i32
  }
  func.func @transform_2(%arg0: i32) -> (i32, i32) {
    %c0_i32 = arith.constant 0 : i32
    %c0_i32_0 = arith.constant 0 : i32
    %c0_i32_1 = arith.constant 0 : i32
    return %c0_i32, %c0_i32_0 : i32, i32
  }
  func.func @transform_3(%arg0: i32) -> (i32, i32) {
    %c0_i32 = arith.constant 0 : i32
    %c0_i32_0 = arith.constant 0 : i32
    %c0_i32_1 = arith.constant 0 : i32
    return %c0_i32, %c0_i32_0 : i32, i32
  }
  func.func @transform_4(%arg0: i32) -> i32 {
    %c0_i32 = arith.constant 0 : i32
    %c0_i32_0 = arith.constant 0 : i32
    return %c0_i32 : i32
  }
  func.func @transform_5(%arg0: i32) -> (i32, i32) {
    %c0_i32 = arith.constant 0 : i32
    %c0_i32_0 = arith.constant 0 : i32
    return %c0_i32, %arg0 : i32, i32
  }
}

</mosaic_0001>

<bundles_post_ra>
// kernel: tpu_custom_call.1
= control target key start
LH: loop header
LB: loop body
LE: loop exit
PB: predicated region body
PF: predicated region fallthrough
CT: control target
= control target key end

     0   :  { %11 = vsyncpa [#allocation4], 0  ;;  %s694_s0 = inlined_call_operand.hbm [shape: f32[120,128], index: 0, kind: input, shape index: {}]   ;;  %s695_s1 = inlined_call_operand.vmem [shape: f32[60,120], index: 1, kind: input, shape index: {}]   ;;  %s696_s2 = inlined_call_operand.vmem [shape: f32[60,1], index: 2, kind: input, shape index: {}]   ;;  %s697_s3 = inlined_call_operand.vmem [shape: f32[12,60], index: 3, kind: input, shape index: {}]   ;;  %s698_s4 = inlined_call_operand.<no memory space> [shape: f32[1], index: 4, kind: input, shape index: {}]   ;;  %s699_s5 = inlined_call_operand.hbm [shape: f32[12,128], index: 5, kind: output, shape index: {}]  }
   0x1   :  { %12 = vsyncpa [#allocation5], 0  ;;  %s561_s18 = smov [#allocation3]   ;;  %s513_s22 = scalar_lea.hbm %s694_s0, 1920 }
   0x2   :  { %s18_s19 = sshll.u32 %s561_s18, 4  ;;  %p514_p0 = scmp.ne.s32.totalorder %s694_s0, %s513_s22  ;;  %s19_s19 = int_to_ptr.vmem [resolvable:$true] %s18_s19 }
   0x3   :  { %p517_p1 = scmp.lt.u32.totalorder %s513_s22, %s694_s0 }
   0x5   :  { %p519_p2 = pnand %p517_p1, %p514_p0 }
   0x7   :  { %522 = shalt.err (!%p519_p2)
}
   0x8   :  { %s523_s27 = scalar_lea.vmem %s19_s19, 1920  ;;  %p528_p4 = scmp.lt.s32.totalorder %s19_s19, %s19_s19 }
   0x9   :  { %p524_p3 = scmp.ne.s32.totalorder %s19_s19, %s523_s27  ;;  %p529_p5 = scmp.lt.s32.totalorder %s523_s27, %s523_s27 }
   0xb   :  { %p530_p6 = por %p529_p5, %p528_p4 }
   0xd   :  { %p531_p7 = pnand %p530_p6, %p524_p3 }
   0xf   :  { %534 = shalt.err (!%p531_p7)
}
  0x10   :  { %s562_s28 = smov 128   ;;  %s563_s29 = smov 8  }
  0x11   :  { %24 = dma.hbm_to_vmem [thread:$0]  %s694_s0, 1920, %s19_s19, [#allocation4], %s562_s28, %s562_s28, %s563_s29  }
  0x12   :  { %557 = dma.done.wait [#allocation4], 1920  }
  0x13   :  { %558 = vsyncadd [#allocation4], 4294965376  ;;  %v564_v0 = vmov 0   ;;  %v44_v1 = vld [vmem:[#allocation3] sm:$0xff]  ;;  %v45_v2 = vld [vmem:[#allocation3 + $0x8] sm:$0xff]  ;;  %vm107_vm0 = vcmask 982016  }
  0x14   :  { %511 = vset.pattern.permute.xlu0 %v564_v0  ;;  %512 = vset.pattern.permute.xlu1 %v564_v0  ;;  %v46_v3 = vld [vmem:[#allocation3 + $0x10] sm:$0xff]  ;;  %v459_v4 = vpack.c.bf16 %v45_v2, %v44_v1  ;;  %v47_v5 = vld [vmem:[#allocation3 + $0x18] sm:$0xff]  ;;  %v48_v7 = vld [vmem:[#allocation3 + $0x20] sm:$0xff]  ;;  %vm249_vm1 = vcmask 490496   ;;  %vm256_vm2 = vcmask 1043456   ;;  %vm565_vm3 = vmmov 1  }
  0x15   :  { %v463_v6 = vpack.c.bf16 %v47_v5, %v46_v3  ;;  %v49_v8 = vld [vmem:[#allocation3 + $0x28] sm:$0xff]  ;;  %v36_v10 = vld [vmem:[%s695_s1] sm:$0xff]  ;;  %v50_v11 = vld [vmem:[#allocation3 + $0x30] sm:$0xff]  ;;  %s566_s18 = smov [#allocation6]  }
  0x16   :  { %460 = vmatprep.subr.bf16.mxu0 %v459_v4  ;;  %v467_v9 = vpack.c.bf16 %v49_v8, %v48_v7  ;;  %v51_v12 = vld [vmem:[#allocation3 + $0x38] sm:$0xff]  ;;  %428 = vmatprep.mubr.msk.f32.mxu0 %vm107_vm0, %v36_v10  ;;  %v59_v13 = vld [vmem:[%s696_s2] sm:$0xff]  ;;  %v61_v14 = vld [vmem:[%s696_s2 + $0x10] sm:$0xff]  ;;  %s342_s19 = sshll.u32 %s566_s18, 4  ;;  %s343_s19 = int_to_ptr.vmem [resolvable:$true] %s342_s19 }
  0x17   :  { %462 = vmatpush3.bf16.msra.mxu0 %v459_v4  ;;  %69 = vperm.xlu0 %511, %v59_v13   ;;  %v471_v15 = vpack.c.bf16 %v51_v12, %v50_v11  ;;  %v60_v16 = vld [vmem:[%s696_s2 + $0x8] sm:$0xff]  ;;  %v52_v17 = vld [vmem:[#allocation3 + $0x40] sm:$0xff]  ;;  %v62_v19 = vld [vmem:[%s696_s2 + $0x18] sm:$0xff]  ;;  %v248_v13 = vstv %s698_s4  ;;  %s535_s20 = scalar_lea.vmem %s343_s19, 256  ;;  %p540_p9 = scmp.lt.s32.totalorder %s343_s19, %s343_s19 }
  0x18   :  { %464 = vmatprep.subr.bf16.mxu0 %v463_v6  ;;  %79 = vperm.xlu1 %512, %v61_v14   ;;  %v53_v18 = vld [vmem:[#allocation3 + $0x48] sm:$0xff]  ;;  %v63_v21 = vld [vmem:[%s696_s2 + $0x20] sm:$0xff]  ;;  %v54_v22 = vld [vmem:[#allocation3 + $0x50] sm:$0xff]  ;;  %p536_p8 = scmp.ne.s32.totalorder %s343_s19, %s535_s20  ;;  %p541_p10 = scmp.lt.s32.totalorder %s535_s20, %s535_s20 }
  0x19   :  { %v475_v20 = vpack.c.bf16 %v53_v18, %v52_v17  ;;  %v55_v23 = vld [vmem:[#allocation3 + $0x58] sm:$0xff]  ;;  %v64_v24 = vld [vmem:[%s696_s2 + $0x28] sm:$0xff]  ;;  %v65_v26 = vld [vmem:[%s696_s2 + $0x30] sm:$0xff] }
  0x1a   :  { %v479_v25 = vpack.c.bf16 %v55_v23, %v54_v22  ;;  %v56_v27 = vld [vmem:[#allocation3 + $0x60] sm:$0xff]  ;;  %v57_v28 = vld [vmem:[#allocation3 + $0x68] sm:$0xff]  ;;  %v66_v29 = vld [vmem:[%s696_s2 + $0x38] sm:$0xf]  ;;  %p542_p11 = por %p541_p10, %p540_p9 }
  0x1b   :  { %466 = vmatpush3.bf16.msra.mxu0 %v463_v6  ;;  %74 = vperm.xlu0 %511, %v60_v16   ;;  %v483_v30 = vpack.c.bf16 %v57_v28, %v56_v27  ;;  %v58_v31 = vld [vmem:[#allocation3 + $0x70] sm:$0xff]  ;;  %v37_v32 = vld [vmem:[%s695_s1 + $0x8] sm:$0xff]  ;;  %v39_v34 = vld [vmem:[%s695_s1 + $0x18] sm:$0xff] }
  0x1c   :  { %468 = vmatprep.subr.bf16.mxu0 %v467_v9  ;;  %84 = vperm.xlu1 %512, %v62_v19   ;;  %v38_v33 = vld [vmem:[%s695_s1 + $0x10] sm:$0xff]  ;;  %v40_v35 = vld [vmem:[%s695_s1 + $0x20] sm:$0xff]  ;;  %v41_v36 = vld [vmem:[%s695_s1 + $0x28] sm:$0xff]  ;;  %p543_p12 = pnand %p542_p11, %p536_p8 }
  0x1d   :  { %v42_v37 = vld [vmem:[%s695_s1 + $0x30] sm:$0xff]  ;;  %v43_v38 = vld [vmem:[%s695_s1 + $0x38] sm:$0xf]  ;;  %v245_v39 = vld [vmem:[%s697_s3] sm:$0xff] }
  0x1e   :  { %456 = vmatprep.mubr.msk.f32.mxu1 %vm249_vm1, %v245_v39  ;;  %vm500_vm4 = vmpackc.low %vm256_vm2, %vm565_vm3  ;;  %v246_v12 = vld [vmem:[%s697_s3 + $0x8] sm:$0xf] }
  0x1f   :  { %470 = vmatpush3.bf16.msra.mxu0 %v467_v9  ;;  %89 = vperm.xlu0 %511, %v63_v21  }
  0x20   :  { %472 = vmatprep.subr.bf16.mxu0 %v471_v15  ;;  %94 = vperm.xlu1 %512, %v64_v24  }
  0x23   :  { %474 = vmatpush3.bf16.msra.mxu0 %v471_v15  ;;  %99 = vperm.xlu0 %511, %v65_v26  }
  0x24   :  { %476 = vmatprep.subr.bf16.mxu0 %v475_v20  ;;  %104 = vperm.xlu1 %512, %v66_v29  }
  0x27   :  { %478 = vmatpush3.bf16.msra.mxu0 %v475_v20 }
  0x28   :  { %480 = vmatprep.subr.bf16.mxu0 %v479_v25 }
  0x2b   :  { %482 = vmatpush3.bf16.msra.mxu0 %v479_v25 }
  0x2c   :  { %484 = vmatprep.subr.bf16.mxu0 %v483_v30 }
  0x2f   :  { %486 = vmatpush3.bf16.msra.mxu0 %v483_v30 }
  0x30   :  { %426 = vmatprep.subr.mxu0 %v58_v31 }
  0x33   :  { %427 = vmatpush3.msra.mxu0 %v58_v31 }
  0x34   :  { %429 = vmatmul.mubr.msk.f32.vlgmr.msra.gmra.mrb[0].mxu0 %vm107_vm0, %v37_v32 }
  0x35   :  { %431 = vmatprep.mubr.msk.f32.mxu0 %vm107_vm0, %v38_v33 }
  0x38   :  { %432 = vmatmul.mubr.msk.f32.gmra.mrb[2].mxu0 %vm107_vm0, %v39_v34 }
  0x39   :  { %434 = vmatprep.mubr.msk.f32.mxu0 %vm107_vm0, %v40_v35 }
  0x3c   :  { %435 = vmatmul.mubr.msk.f32.gmra.mrb[4].mxu0 %vm107_vm0, %v41_v36 }
  0x3d   :  { %437 = vmatprep.mubr.msk.f32.mxu0 %vm107_vm0, %v42_v37 }
  0x40   :  { %438 = vmatmul.mubr.msk.f32.gmra.mrb[6].mxu0 %vm107_vm0, %v43_v38 }
  0x96   :  { %v70_v40 = vpop.permute.xlu0 %69 }
  0x97   :  { %v80_v41 = vpop.permute.xlu1 %79 }
  0x9a   :  { %v75_v42 = vpop.permute.xlu0 %74 }
  0x9b   :  { %v85_v43 = vpop.permute.xlu1 %84 }
  0x9e   :  { %v90_v56 = vpop.permute.xlu0 %89 }
  0x9f   :  { %v95_v53 = vpop.permute.xlu1 %94 }
  0xa2   :  { %v100_v4 = vpop.permute.xlu0 %99 }
  0xa3   :  { %v105_v1 = vpop.permute.xlu1 %104 }
 0x107   :  { %v430_v44 = vpop.f32.mrb[0].mxu0 }
 0x108   :  { %v204_v45 = vadd.f32 %v430_v44, %v75_v42  ;;  %v198_v46 = vpop.f32.mrb[1].mxu0 }
 0x109   :  { %v199_v47 = vadd.f32 %v198_v46, %v70_v40 }
 0x10a   :  { %v238_v48 = vmax.f32 %v204_v45, 0.0 }
 0x10b   :  { %v237_v49 = vmax.f32 %v199_v47, 0.0  ;;  %v433_v50 = vpop.f32.mrb[2].mxu0 }
 0x10c   :  { %v214_v51 = vadd.f32 %v433_v50, %v85_v43  ;;  %v208_v52 = vpop.f32.mrb[3].mxu0 }
 0x10d   :  { %v209_v54 = vadd.f32 %v208_v52, %v80_v41  ;;  %v487_v55 = vpack.c.bf16 %v238_v48, %v237_v49 }
 0x10e   :  { %v240_v57 = vmax.f32 %v214_v51, 0.0 }
 0x10f   :  { %v239_v58 = vmax.f32 %v209_v54, 0.0  ;;  %v436_v59 = vpop.f32.mrb[4].mxu0  ;;  %488 = vmatprep.subr.bf16.mxu1 %v487_v55 }
 0x110   :  { %v224_v60 = vadd.f32 %v436_v59, %v95_v53  ;;  %v218_v61 = vpop.f32.mrb[5].mxu0  ;;  %490 = vmatpush3.bf16.msra.mxu1 %v487_v55 }
 0x111   :  { %v491_v62 = vpack.c.bf16 %v240_v57, %v239_v58  ;;  %v219_v63 = vadd.f32 %v218_v61, %v90_v56 }
 0x112   :  { %v242_v0 = vmax.f32 %v224_v60, 0.0 }
 0x113   :  { %v241_v2 = vmax.f32 %v219_v63, 0.0  ;;  %v439_v3 = vpop.f32.mrb[6].mxu0  ;;  %492 = vmatprep.subr.bf16.mxu1 %v491_v62 }
 0x114   :  { %v234_v5 = vadd.f32 %v439_v3, %v105_v1  ;;  %v228_v6 = vpop.f32.mrb[7].mxu0  ;;  %494 = vmatpush3.bf16.msra.mxu1 %v491_v62 }
 0x115   :  { %v495_v7 = vpack.c.bf16 %v242_v0, %v241_v2  ;;  %v229_v8 = vadd.f32 %v228_v6, %v100_v4 }
 0x116   :  { %v244_v9 = vmax.f32 %v234_v5, 0.0 }
 0x117   :  { %v243_v10 = vmax.f32 %v229_v8, 0.0  ;;  %496 = vmatprep.subr.bf16.mxu1 %v495_v7 }
 0x118   :  { %498 = vmatpush3.bf16.msra.mxu1 %v495_v7 }
 0x119   :  { %v499_v11 = vpack.c.bf16 %v244_v9, %v243_v10 }
 0x11b   :  { %501 = vmatprep.subr.msk.bf16.mxu1 %vm500_vm4, %v499_v11 }
 0x11c   :  { %504 = vmatpush3.bf16.msk.msra.mxu1 %vm500_vm4, %v499_v11 }
 0x11f   :  { %457 = vmatmul.mubr.msk.f32.vlgmr.msra.gmra.mrb[0].mxu1 %vm249_vm1, %v246_v12 }
 0x1f2   :  { %v458_v14 = vpop.f32.mrb[0].mxu1 }
 0x1f3   :  { %v332_v15 = vadd.f32 %v458_v14, %v248_v13  ;;  %v326_v16 = vpop.f32.mrb[1].mxu1 }
 0x1f4   :  { %v327_v17 = vadd.f32 %v326_v16, %v248_v13 }
 0x1f5   :  { %336 = vst [vmem:[#allocation6 + $0x8] sm:$0xf] %v332_v15 }
 0x1f6   :  { %335 = vst [vmem:[#allocation6] sm:$0xff] %v327_v17 }
 0x1f7   :  { %546 = shalt.err (!%p543_p12)
}
 0x1f8   :  { %s547_s4 = scalar_lea.hbm %s699_s5, 256 }
 0x1f9   :  { %p548_p13 = scmp.ne.s32.totalorder %s699_s5, %s547_s4  ;;  %p551_p0 = scmp.lt.u32.totalorder %s547_s4, %s699_s5 }
 0x1fb   :  { %p553_p1 = pnand %p551_p0, %p548_p13 }
 0x1fd   :  { %556 = shalt.err (!%p553_p1)
}
 0x1fe   :  { %348 = dma.vmem_to_hbm [thread:$0]  %s343_s19, 256, %s699_s5, [#allocation5], %s562_s28, %s562_s28, %s563_s29  }
 0x1ff   :  { %559 = dma.done.wait [#allocation5], 256  }
 0x200   :  { %560 = vsyncadd [#allocation5], 4294967040 }
 0x201   :  { %352 = vsyncpa [#allocation4], 1 }
 0x202   :  { %353 = vsyncpa [#allocation5], 1 }

</bundles_post_ra>
